<compile_context>
chip_gen: v7x
topology: tpu7x:2x2x1
jax: 0.10.0
libtpu: 0.0.40
codegen_flags: <defaults>
</compile_context>

<pallas_src>
import jax
import jax.numpy as jnp
import numpy as np
from jax.experimental import pallas as pl
from jax.experimental.pallas import tpu as pltpu


# ----------------------------- Pallas kernel -------------------------------
def gru_kernel(x_ref, wih_ref, whh_ref, bih_ref, bhh_ref, wf_ref, bf_ref,
               out_ref, logits_ref):
    T, B, H = out_ref.shape

    # ---- Phase 1: hoisted input-to-hidden projection for ALL timesteps ----
    # (T*B, I) @ (I, 3H) + (1, 3H)  ->  (T*B, 3H), one MXU pass.
    gih = jnp.dot(x_ref[...], wih_ref[...],
                  preferred_element_type=jnp.float32) + bih_ref[...]

    whh = whh_ref[...]            # (H, 3H)  fused recurrent weights (r|z|n)
    bhh = bhh_ref[...]            # (1, 3H)

    # ---- Phase 2: sequential recurrence (fully unrolled, T small/static) ---
    h = jnp.zeros((B, H), jnp.float32)          # h_0 = 0 (PyTorch default)
    last_rows = []
    for t in range(T):
        g_ih = gih[t * B:(t + 1) * B, :]        # (B, 3H), static slice
        g_hh = jnp.dot(h, whh, preferred_element_type=jnp.float32) + bhh
        # PyTorch GRU gate order: r, z, n
        r = jax.nn.sigmoid(g_ih[:, 0 * H:1 * H] + g_hh[:, 0 * H:1 * H])
        z = jax.nn.sigmoid(g_ih[:, 1 * H:2 * H] + g_hh[:, 1 * H:2 * H])
        n = jnp.tanh(g_ih[:, 2 * H:3 * H] + r * g_hh[:, 2 * H:3 * H])
        h = (1.0 - z) * n + z * h
        out_ref[t] = h.astype(out_ref.dtype)    # VMEM-resident out block
        last_rows.append(h[B - 1:B, :])         # out[t, -1, :]  -> (1, H)

    # ---- Phase 3: Linear(H,1) + Sigmoid as VPU mul + XLU lane reduce -------
    last = jnp.concatenate(last_rows, axis=0)   # (T, H), lane-dense slab
    logit = jnp.sum(last * wf_ref[...], axis=-1, keepdims=True) + bf_ref[...]
    logits_ref[...] = jax.nn.sigmoid(logit).astype(logits_ref.dtype)


def base_gru_forward(x, wih, whh, bih, bhh, wf, bf):
    """x: (T, B, I).  wih: (I, 3H), whh: (H, 3H), bih/bhh: (1, 3H),
    wf: (1, H), bf: (1, 1).  Returns (out (T,B,H), logits (T,1))."""
    T, B, I = x.shape
    H = whh.shape[0]
    x2d = x.reshape(T * B, I)                   # free layout change outside kernel

    vmem = pl.BlockSpec(memory_space=pltpu.MemorySpace.VMEM)
    out, logits = pl.pallas_call(
        gru_kernel,
        out_shape=(jax.ShapeDtypeStruct((T, B, H), jnp.float32),
                   jax.ShapeDtypeStruct((T, 1), jnp.float32)),
        in_specs=[vmem] * 7,                    # whole arrays resident in VMEM
        out_specs=(vmem, vmem),
    )(x2d, wih, whh, bih, bhh, wf, bf)
    return out, logits


# --------------------------- pure-JAX reference -----------------------------
def base_gru_reference(x, wih, whh, bih, bhh, wf, bf):
    T, B, I = x.shape
    H = whh.shape[0]

    def step(h, x_t):
        gi = x_t @ wih + bih                    # (B, 3H)
        gh = h @ whh + bhh                      # (B, 3H)
        r = jax.nn.sigmoid(gi[:, :H] + gh[:, :H])
        z = jax.nn.sigmoid(gi[:, H:2 * H] + gh[:, H:2 * H])
        n = jnp.tanh(gi[:, 2 * H:] + r * gh[:, 2 * H:])
        h_new = (1.0 - z) * n + z * h
        return h_new, h_new

    _, out = jax.lax.scan(step, jnp.zeros((B, H), jnp.float32), x)
    last = out[:, -1, :]                        # (T, H)
    logits = jax.nn.sigmoid(last @ wf.T + bf)   # (T, 1)
    return out, logits


# --------------------------------- main -------------------------------------
if __name__ == "__main__":
    T, B, I, H = 8, 2, 4, 32            # seq_len, batch, input_size, hidden
    key = jax.random.PRNGKey(0)
    ks = jax.random.split(key, 7)

    # PyTorch-style init: U(-1/sqrt(H), 1/sqrt(H)).  Gate weights are stored
    # pre-transposed and fused: W_ih (I, 3H), W_hh (H, 3H), biases (1, 3H),
    # gate order r|z|n along the 3H axis.  Final layer: wf (1, H), bf (1, 1).
    bound = 1.0 / np.sqrt(H)
    u = lambda k, shape: jax.random.uniform(k, shape, jnp.float32, -bound, bound)

    x   = jax.random.normal(ks[0], (T, B, I), jnp.float32)
    wih = u(ks[1], (I, 3 * H))
    whh = u(ks[2], (H, 3 * H))
    bih = u(ks[3], (1, 3 * H))
    bhh = u(ks[4], (1, 3 * H))
    wf  = u(ks[5], (1, H))
    bf  = u(ks[6], (1, 1))

    out, logits = base_gru_forward(x, wih, whh, bih, bhh, wf, bf)
    jax.block_until_ready((out, logits))

    out_ref, logits_ref = base_gru_reference(x, wih, whh, bih, bhh, wf, bf)
    assert logits.shape == (T, 1)
    np.testing.assert_allclose(np.asarray(out), np.asarray(out_ref),
                               rtol=1e-3, atol=1e-3)
    np.testing.assert_allclose(np.asarray(logits), np.asarray(logits_ref),
                               rtol=1e-3, atol=1e-3)
    print("KERNEL_OK")
</pallas_src>

<mosaic_0001>
module attributes {stable_mosaic.version = 11 : i64} {
  func.func @gru_kernel(%arg0: memref<16x4xf32, #tpu.memory_space<vmem>>, %arg1: memref<4x96xf32, #tpu.memory_space<vmem>>, %arg2: memref<32x96xf32, #tpu.memory_space<vmem>>, %arg3: memref<1x96xf32, #tpu.memory_space<vmem>>, %arg4: memref<1x96xf32, #tpu.memory_space<vmem>>, %arg5: memref<1x32xf32, #tpu.memory_space<vmem>>, %arg6: memref<1x1xf32, #tpu.memory_space<vmem>>, %arg7: memref<8x2x32xf32, #tpu.memory_space<vmem>>, %arg8: memref<8x1xf32, #tpu.memory_space<vmem>>) attributes {dimension_semantics = [], scalar_prefetch = 0 : i64, scratch_operands = 0 : i64, tpu.core_type = #tpu.core_type<tc>} {
    %c0 = arith.constant 0 : index
    %c0_0 = arith.constant 0 : index
    %0 = vector.load %arg0[%c0, %c0_0] : memref<16x4xf32, #tpu.memory_space<vmem>>, vector<16x4xf32>
    %c0_1 = arith.constant 0 : index
    %c0_2 = arith.constant 0 : index
    %1 = vector.load %arg1[%c0_1, %c0_2] : memref<4x96xf32, #tpu.memory_space<vmem>>, vector<4x96xf32>
    %cst = arith.constant dense<0.000000e+00> : vector<16x96xf32>
    %2 = tpu.matmul %0, %1, %cst {dimension_numbers = #tpu.dot_dimension_numbers<[1], [0], [0], [1], [0, 0, 1, 1], [], []>} : vector<16x4xf32>, vector<4x96xf32>, vector<16x96xf32> -> vector<16x96xf32>
    %c0_3 = arith.constant 0 : index
    %c0_4 = arith.constant 0 : index
    %3 = vector.load %arg3[%c0_3, %c0_4] : memref<1x96xf32, #tpu.memory_space<vmem>>, vector<1x96xf32>
    %4 = vector.broadcast %3 : vector<1x96xf32> to vector<16x96xf32>
    %5 = arith.addf %2, %4 : vector<16x96xf32>
    %c0_5 = arith.constant 0 : index
    %c0_6 = arith.constant 0 : index
    %6 = vector.load %arg2[%c0_5, %c0_6] : memref<32x96xf32, #tpu.memory_space<vmem>>, vector<32x96xf32>
    %c0_7 = arith.constant 0 : index
    %c0_8 = arith.constant 0 : index
    %7 = vector.load %arg4[%c0_7, %c0_8] : memref<1x96xf32, #tpu.memory_space<vmem>>, vector<1x96xf32>
    %cst_9 = arith.constant 0.000000e+00 : f32
    %8 = vector.broadcast %cst_9 : f32 to vector<2x32xf32>
    %9 = vector.extract_strided_slice %5 {offsets = [0, 0], sizes = [2, 96], strides = [1, 1]} : vector<16x96xf32> to vector<2x96xf32>
    %cst_10 = arith.constant dense<0.000000e+00> : vector<2x96xf32>
    %10 = tpu.matmul %8, %6, %cst_10 {dimension_numbers = #tpu.dot_dimension_numbers<[1], [0], [0], [1], [0, 0, 1, 1], [], []>} : vector<2x32xf32>, vector<32x96xf32>, vector<2x96xf32> -> vector<2x96xf32>
    %11 = vector.broadcast %7 : vector<1x96xf32> to vector<2x96xf32>
    %12 = arith.addf %10, %11 : vector<2x96xf32>
    %13 = vector.extract_strided_slice %9 {offsets = [0, 0], sizes = [2, 32], strides = [1, 1]} : vector<2x96xf32> to vector<2x32xf32>
    %14 = vector.extract_strided_slice %12 {offsets = [0, 0], sizes = [2, 32], strides = [1, 1]} : vector<2x96xf32> to vector<2x32xf32>
    %15 = arith.addf %13, %14 : vector<2x32xf32>
    %16 = arith.negf %15 : vector<2x32xf32>
    %17 = math.exp %16 : vector<2x32xf32>
    %cst_11 = arith.constant 1.000000e+00 : f32
    %18 = vector.broadcast %cst_11 : f32 to vector<2x32xf32>
    %19 = arith.addf %18, %17 : vector<2x32xf32>
    %20 = arith.divf %18, %19 : vector<2x32xf32>
    %21 = vector.extract_strided_slice %9 {offsets = [0, 32], sizes = [2, 32], strides = [1, 1]} : vector<2x96xf32> to vector<2x32xf32>
    %22 = vector.extract_strided_slice %12 {offsets = [0, 32], sizes = [2, 32], strides = [1, 1]} : vector<2x96xf32> to vector<2x32xf32>
    %23 = arith.addf %21, %22 : vector<2x32xf32>
    %24 = arith.negf %23 : vector<2x32xf32>
    %25 = math.exp %24 : vector<2x32xf32>
    %cst_12 = arith.constant 1.000000e+00 : f32
    %26 = vector.broadcast %cst_12 : f32 to vector<2x32xf32>
    %27 = arith.addf %26, %25 : vector<2x32xf32>
    %28 = arith.divf %26, %27 : vector<2x32xf32>
    %29 = vector.extract_strided_slice %9 {offsets = [0, 64], sizes = [2, 32], strides = [1, 1]} : vector<2x96xf32> to vector<2x32xf32>
    %30 = vector.extract_strided_slice %12 {offsets = [0, 64], sizes = [2, 32], strides = [1, 1]} : vector<2x96xf32> to vector<2x32xf32>
    %31 = arith.mulf %20, %30 : vector<2x32xf32>
    %32 = arith.addf %29, %31 : vector<2x32xf32>
    %33 = math.tanh %32 : vector<2x32xf32>
    %cst_13 = arith.constant 1.000000e+00 : f32
    %34 = vector.broadcast %cst_13 : f32 to vector<2x32xf32>
    %35 = arith.subf %34, %28 : vector<2x32xf32>
    %36 = arith.mulf %35, %33 : vector<2x32xf32>
    %37 = arith.mulf %28, %8 : vector<2x32xf32>
    %38 = arith.addf %36, %37 : vector<2x32xf32>
    %c0_14 = arith.constant 0 : index
    %c0_15 = arith.constant 0 : index
    %c0_16 = arith.constant 0 : index
    %39 = vector.load %arg7[%c0_14, %c0_15, %c0_16] : memref<8x2x32xf32, #tpu.memory_space<vmem>>, vector<1x2x32xf32>
    %40 = vector.shape_cast %39 : vector<1x2x32xf32> to vector<2x32xf32>
    %41 = vector.shape_cast %38 : vector<2x32xf32> to vector<1x2x32xf32>
    tpu.vector_store %arg7[%c0_14, %c0_15, %c0_16], %41 {strides = array<i32>} : memref<8x2x32xf32, #tpu.memory_space<vmem>>, vector<1x2x32xf32>,
    %42 = vector.extract_strided_slice %38 {offsets = [1, 0], sizes = [1, 32], strides = [1, 1]} : vector<2x32xf32> to vector<1x32xf32>
    %43 = vector.extract_strided_slice %5 {offsets = [2, 0], sizes = [2, 96], strides = [1, 1]} : vector<16x96xf32> to vector<2x96xf32>
    %cst_17 = arith.constant dense<0.000000e+00> : vector<2x96xf32>
    %44 = tpu.matmul %38, %6, %cst_17 {dimension_numbers = #tpu.dot_dimension_numbers<[1], [0], [0], [1], [0, 0, 1, 1], [], []>} : vector<2x32xf32>, vector<32x96xf32>, vector<2x96xf32> -> vector<2x96xf32>
    %45 = vector.broadcast %7 : vector<1x96xf32> to vector<2x96xf32>
    %46 = arith.addf %44, %45 : vector<2x96xf32>
    %47 = vector.extract_strided_slice %43 {offsets = [0, 0], sizes = [2, 32], strides = [1, 1]} : vector<2x96xf32> to vector<2x32xf32>
    %48 = vector.extract_strided_slice %46 {offsets = [0, 0], sizes = [2, 32], strides = [1, 1]} : vector<2x96xf32> to vector<2x32xf32>
    %49 = arith.addf %47, %48 : vector<2x32xf32>
    %50 = arith.negf %49 : vector<2x32xf32>
    %51 = math.exp %50 : vector<2x32xf32>
    %cst_18 = arith.constant 1.000000e+00 : f32
    %52 = vector.broadcast %cst_18 : f32 to vector<2x32xf32>
    %53 = arith.addf %52, %51 : vector<2x32xf32>
    %54 = arith.divf %52, %53 : vector<2x32xf32>
    %55 = vector.extract_strided_slice %43 {offsets = [0, 32], sizes = [2, 32], strides = [1, 1]} : vector<2x96xf32> to vector<2x32xf32>
    %56 = vector.extract_strided_slice %46 {offsets = [0, 32], sizes = [2, 32], strides = [1, 1]} : vector<2x96xf32> to vector<2x32xf32>
    %57 = arith.addf %55, %56 : vector<2x32xf32>
    %58 = arith.negf %57 : vector<2x32xf32>
    %59 = math.exp %58 : vector<2x32xf32>
    %cst_19 = arith.constant 1.000000e+00 : f32
    %60 = vector.broadcast %cst_19 : f32 to vector<2x32xf32>
    %61 = arith.addf %60, %59 : vector<2x32xf32>
    %62 = arith.divf %60, %61 : vector<2x32xf32>
    %63 = vector.extract_strided_slice %43 {offsets = [0, 64], sizes = [2, 32], strides = [1, 1]} : vector<2x96xf32> to vector<2x32xf32>
    %64 = vector.extract_strided_slice %46 {offsets = [0, 64], sizes = [2, 32], strides = [1, 1]} : vector<2x96xf32> to vector<2x32xf32>
    %65 = arith.mulf %54, %64 : vector<2x32xf32>
    %66 = arith.addf %63, %65 : vector<2x32xf32>
    %67 = math.tanh %66 : vector<2x32xf32>
    %cst_20 = arith.constant 1.000000e+00 : f32
    %68 = vector.broadcast %cst_20 : f32 to vector<2x32xf32>
    %69 = arith.subf %68, %62 : vector<2x32xf32>
    %70 = arith.mulf %69, %67 : vector<2x32xf32>
    %71 = arith.mulf %62, %38 : vector<2x32xf32>
    %72 = arith.addf %70, %71 : vector<2x32xf32>
    %c1 = arith.constant 1 : index
    %c0_21 = arith.constant 0 : index
    %c0_22 = arith.constant 0 : index
    %73 = vector.load %arg7[%c1, %c0_21, %c0_22] : memref<8x2x32xf32, #tpu.memory_space<vmem>>, vector<1x2x32xf32>
    %74 = vector.shape_cast %73 : vector<1x2x32xf32> to vector<2x32xf32>
    %75 = vector.shape_cast %72 : vector<2x32xf32> to vector<1x2x32xf32>
    tpu.vector_store %arg7[%c1, %c0_21, %c0_22], %75 {strides = array<i32>} : memref<8x2x32xf32, #tpu.memory_space<vmem>>, vector<1x2x32xf32>,
    %76 = vector.extract_strided_slice %72 {offsets = [1, 0], sizes = [1, 32], strides = [1, 1]} : vector<2x32xf32> to vector<1x32xf32>
    %77 = vector.extract_strided_slice %5 {offsets = [4, 0], sizes = [2, 96], strides = [1, 1]} : vector<16x96xf32> to vector<2x96xf32>
    %cst_23 = arith.constant dense<0.000000e+00> : vector<2x96xf32>
    %78 = tpu.matmul %72, %6, %cst_23 {dimension_numbers = #tpu.dot_dimension_numbers<[1], [0], [0], [1], [0, 0, 1, 1], [], []>} : vector<2x32xf32>, vector<32x96xf32>, vector<2x96xf32> -> vector<2x96xf32>
    %79 = vector.broadcast %7 : vector<1x96xf32> to vector<2x96xf32>
    %80 = arith.addf %78, %79 : vector<2x96xf32>
    %81 = vector.extract_strided_slice %77 {offsets = [0, 0], sizes = [2, 32], strides = [1, 1]} : vector<2x96xf32> to vector<2x32xf32>
    %82 = vector.extract_strided_slice %80 {offsets = [0, 0], sizes = [2, 32], strides = [1, 1]} : vector<2x96xf32> to vector<2x32xf32>
    %83 = arith.addf %81, %82 : vector<2x32xf32>
    %84 = arith.negf %83 : vector<2x32xf32>
    %85 = math.exp %84 : vector<2x32xf32>
    %cst_24 = arith.constant 1.000000e+00 : f32
    %86 = vector.broadcast %cst_24 : f32 to vector<2x32xf32>
    %87 = arith.addf %86, %85 : vector<2x32xf32>
    %88 = arith.divf %86, %87 : vector<2x32xf32>
    %89 = vector.extract_strided_slice %77 {offsets = [0, 32], sizes = [2, 32], strides = [1, 1]} : vector<2x96xf32> to vector<2x32xf32>
    %90 = vector.extract_strided_slice %80 {offsets = [0, 32], sizes = [2, 32], strides = [1, 1]} : vector<2x96xf32> to vector<2x32xf32>
    %91 = arith.addf %89, %90 : vector<2x32xf32>
    %92 = arith.negf %91 : vector<2x32xf32>
    %93 = math.exp %92 : vector<2x32xf32>
    %cst_25 = arith.constant 1.000000e+00 : f32
    %94 = vector.broadcast %cst_25 : f32 to vector<2x32xf32>
    %95 = arith.addf %94, %93 : vector<2x32xf32>
    %96 = arith.divf %94, %95 : vector<2x32xf32>
    %97 = vector.extract_strided_slice %77 {offsets = [0, 64], sizes = [2, 32], strides = [1, 1]} : vector<2x96xf32> to vector<2x32xf32>
    %98 = vector.extract_strided_slice %80 {offsets = [0, 64], sizes = [2, 32], strides = [1, 1]} : vector<2x96xf32> to vector<2x32xf32>
    %99 = arith.mulf %88, %98 : vector<2x32xf32>
    %100 = arith.addf %97, %99 : vector<2x32xf32>
    %101 = math.tanh %100 : vector<2x32xf32>
    %cst_26 = arith.constant 1.000000e+00 : f32
    %102 = vector.broadcast %cst_26 : f32 to vector<2x32xf32>
    %103 = arith.subf %102, %96 : vector<2x32xf32>
    %104 = arith.mulf %103, %101 : vector<2x32xf32>
    %105 = arith.mulf %96, %72 : vector<2x32xf32>
    %106 = arith.addf %104, %105 : vector<2x32xf32>
    %c2 = arith.constant 2 : index
    %c0_27 = arith.constant 0 : index
    %c0_28 = arith.constant 0 : index
    %107 = vector.load %arg7[%c2, %c0_27, %c0_28] : memref<8x2x32xf32, #tpu.memory_space<vmem>>, vector<1x2x32xf32>
    %108 = vector.shape_cast %107 : vector<1x2x32xf32> to vector<2x32xf32>
    %109 = vector.shape_cast %106 : vector<2x32xf32> to vector<1x2x32xf32>
    tpu.vector_store %arg7[%c2, %c0_27, %c0_28], %109 {strides = array<i32>} : memref<8x2x32xf32, #tpu.memory_space<vmem>>, vector<1x2x32xf32>,
    %110 = vector.extract_strided_slice %106 {offsets = [1, 0], sizes = [1, 32], strides = [1, 1]} : vector<2x32xf32> to vector<1x32xf32>
    %111 = vector.extract_strided_slice %5 {offsets = [6, 0], sizes = [2, 96], strides = [1, 1]} : vector<16x96xf32> to vector<2x96xf32>
    %cst_29 = arith.constant dense<0.000000e+00> : vector<2x96xf32>
    %112 = tpu.matmul %106, %6, %cst_29 {dimension_numbers = #tpu.dot_dimension_numbers<[1], [0], [0], [1], [0, 0, 1, 1], [], []>} : vector<2x32xf32>, vector<32x96xf32>, vector<2x96xf32> -> vector<2x96xf32>
    %113 = vector.broadcast %7 : vector<1x96xf32> to vector<2x96xf32>
    %114 = arith.addf %112, %113 : vector<2x96xf32>
    %115 = vector.extract_strided_slice %111 {offsets = [0, 0], sizes = [2, 32], strides = [1, 1]} : vector<2x96xf32> to vector<2x32xf32>
    %116 = vector.extract_strided_slice %114 {offsets = [0, 0], sizes = [2, 32], strides = [1, 1]} : vector<2x96xf32> to vector<2x32xf32>
    %117 = arith.addf %115, %116 : vector<2x32xf32>
    %118 = arith.negf %117 : vector<2x32xf32>
    %119 = math.exp %118 : vector<2x32xf32>
    %cst_30 = arith.constant 1.000000e+00 : f32
    %120 = vector.broadcast %cst_30 : f32 to vector<2x32xf32>
    %121 = arith.addf %120, %119 : vector<2x32xf32>
    %122 = arith.divf %120, %121 : vector<2x32xf32>
    %123 = vector.extract_strided_slice %111 {offsets = [0, 32], sizes = [2, 32], strides = [1, 1]} : vector<2x96xf32> to vector<2x32xf32>
    %124 = vector.extract_strided_slice %114 {offsets = [0, 32], sizes = [2, 32], strides = [1, 1]} : vector<2x96xf32> to vector<2x32xf32>
    %125 = arith.addf %123, %124 : vector<2x32xf32>
    %126 = arith.negf %125 : vector<2x32xf32>
    %127 = math.exp %126 : vector<2x32xf32>
    %cst_31 = arith.constant 1.000000e+00 : f32
    %128 = vector.broadcast %cst_31 : f32 to vector<2x32xf32>
    %129 = arith.addf %128, %127 : vector<2x32xf32>
    %130 = arith.divf %128, %129 : vector<2x32xf32>
    %131 = vector.extract_strided_slice %111 {offsets = [0, 64], sizes = [2, 32], strides = [1, 1]} : vector<2x96xf32> to vector<2x32xf32>
    %132 = vector.extract_strided_slice %114 {offsets = [0, 64], sizes = [2, 32], strides = [1, 1]} : vector<2x96xf32> to vector<2x32xf32>
    %133 = arith.mulf %122, %132 : vector<2x32xf32>
    %134 = arith.addf %131, %133 : vector<2x32xf32>
    %135 = math.tanh %134 : vector<2x32xf32>
    %cst_32 = arith.constant 1.000000e+00 : f32
    %136 = vector.broadcast %cst_32 : f32 to vector<2x32xf32>
    %137 = arith.subf %136, %130 : vector<2x32xf32>
    %138 = arith.mulf %137, %135 : vector<2x32xf32>
    %139 = arith.mulf %130, %106 : vector<2x32xf32>
    %140 = arith.addf %138, %139 : vector<2x32xf32>
    %c3 = arith.constant 3 : index
    %c0_33 = arith.constant 0 : index
    %c0_34 = arith.constant 0 : index
    %141 = vector.load %arg7[%c3, %c0_33, %c0_34] : memref<8x2x32xf32, #tpu.memory_space<vmem>>, vector<1x2x32xf32>
    %142 = vector.shape_cast %141 : vector<1x2x32xf32> to vector<2x32xf32>
    %143 = vector.shape_cast %140 : vector<2x32xf32> to vector<1x2x32xf32>
    tpu.vector_store %arg7[%c3, %c0_33, %c0_34], %143 {strides = array<i32>} : memref<8x2x32xf32, #tpu.memory_space<vmem>>, vector<1x2x32xf32>,
    %144 = vector.extract_strided_slice %140 {offsets = [1, 0], sizes = [1, 32], strides = [1, 1]} : vector<2x32xf32> to vector<1x32xf32>
    %145 = vector.extract_strided_slice %5 {offsets = [8, 0], sizes = [2, 96], strides = [1, 1]} : vector<16x96xf32> to vector<2x96xf32>
    %cst_35 = arith.constant dense<0.000000e+00> : vector<2x96xf32>
    %146 = tpu.matmul %140, %6, %cst_35 {dimension_numbers = #tpu.dot_dimension_numbers<[1], [0], [0], [1], [0, 0, 1, 1], [], []>} : vector<2x32xf32>, vector<32x96xf32>, vector<2x96xf32> -> vector<2x96xf32>
    %147 = vector.broadcast %7 : vector<1x96xf32> to vector<2x96xf32>
    %148 = arith.addf %146, %147 : vector<2x96xf32>
    %149 = vector.extract_strided_slice %145 {offsets = [0, 0], sizes = [2, 32], strides = [1, 1]} : vector<2x96xf32> to vector<2x32xf32>
    %150 = vector.extract_strided_slice %148 {offsets = [0, 0], sizes = [2, 32], strides = [1, 1]} : vector<2x96xf32> to vector<2x32xf32>
    %151 = arith.addf %149, %150 : vector<2x32xf32>
    %152 = arith.negf %151 : vector<2x32xf32>
    %153 = math.exp %152 : vector<2x32xf32>
    %cst_36 = arith.constant 1.000000e+00 : f32
    %154 = vector.broadcast %cst_36 : f32 to vector<2x32xf32>
    %155 = arith.addf %154, %153 : vector<2x32xf32>
    %156 = arith.divf %154, %155 : vector<2x32xf32>
    %157 = vector.extract_strided_slice %145 {offsets = [0, 32], sizes = [2, 32], strides = [1, 1]} : vector<2x96xf32> to vector<2x32xf32>
    %158 = vector.extract_strided_slice %148 {offsets = [0, 32], sizes = [2, 32], strides = [1, 1]} : vector<2x96xf32> to vector<2x32xf32>
    %159 = arith.addf %157, %158 : vector<2x32xf32>
    %160 = arith.negf %159 : vector<2x32xf32>
    %161 = math.exp %160 : vector<2x32xf32>
    %cst_37 = arith.constant 1.000000e+00 : f32
    %162 = vector.broadcast %cst_37 : f32 to vector<2x32xf32>
    %163 = arith.addf %162, %161 : vector<2x32xf32>
    %164 = arith.divf %162, %163 : vector<2x32xf32>
    %165 = vector.extract_strided_slice %145 {offsets = [0, 64], sizes = [2, 32], strides = [1, 1]} : vector<2x96xf32> to vector<2x32xf32>
    %166 = vector.extract_strided_slice %148 {offsets = [0, 64], sizes = [2, 32], strides = [1, 1]} : vector<2x96xf32> to vector<2x32xf32>
    %167 = arith.mulf %156, %166 : vector<2x32xf32>
    %168 = arith.addf %165, %167 : vector<2x32xf32>
    %169 = math.tanh %168 : vector<2x32xf32>
    %cst_38 = arith.constant 1.000000e+00 : f32
    %170 = vector.broadcast %cst_38 : f32 to vector<2x32xf32>
    %171 = arith.subf %170, %164 : vector<2x32xf32>
    %172 = arith.mulf %171, %169 : vector<2x32xf32>
    %173 = arith.mulf %164, %140 : vector<2x32xf32>
    %174 = arith.addf %172, %173 : vector<2x32xf32>
    %c4 = arith.constant 4 : index
    %c0_39 = arith.constant 0 : index
    %c0_40 = arith.constant 0 : index
    %175 = vector.load %arg7[%c4, %c0_39, %c0_40] : memref<8x2x32xf32, #tpu.memory_space<vmem>>, vector<1x2x32xf32>
    %176 = vector.shape_cast %175 : vector<1x2x32xf32> to vector<2x32xf32>
    %177 = vector.shape_cast %174 : vector<2x32xf32> to vector<1x2x32xf32>
    tpu.vector_store %arg7[%c4, %c0_39, %c0_40], %177 {strides = array<i32>} : memref<8x2x32xf32, #tpu.memory_space<vmem>>, vector<1x2x32xf32>,
    %178 = vector.extract_strided_slice %174 {offsets = [1, 0], sizes = [1, 32], strides = [1, 1]} : vector<2x32xf32> to vector<1x32xf32>
    %179 = vector.extract_strided_slice %5 {offsets = [10, 0], sizes = [2, 96], strides = [1, 1]} : vector<16x96xf32> to vector<2x96xf32>
    %cst_41 = arith.constant dense<0.000000e+00> : vector<2x96xf32>
    %180 = tpu.matmul %174, %6, %cst_41 {dimension_numbers = #tpu.dot_dimension_numbers<[1], [0], [0], [1], [0, 0, 1, 1], [], []>} : vector<2x32xf32>, vector<32x96xf32>, vector<2x96xf32> -> vector<2x96xf32>
    %181 = vector.broadcast %7 : vector<1x96xf32> to vector<2x96xf32>
    %182 = arith.addf %180, %181 : vector<2x96xf32>
    %183 = vector.extract_strided_slice %179 {offsets = [0, 0], sizes = [2, 32], strides = [1, 1]} : vector<2x96xf32> to vector<2x32xf32>
    %184 = vector.extract_strided_slice %182 {offsets = [0, 0], sizes = [2, 32], strides = [1, 1]} : vector<2x96xf32> to vector<2x32xf32>
    %185 = arith.addf %183, %184 : vector<2x32xf32>
    %186 = arith.negf %185 : vector<2x32xf32>
    %187 = math.exp %186 : vector<2x32xf32>
    %cst_42 = arith.constant 1.000000e+00 : f32
    %188 = vector.broadcast %cst_42 : f32 to vector<2x32xf32>
    %189 = arith.addf %188, %187 : vector<2x32xf32>
    %190 = arith.divf %188, %189 : vector<2x32xf32>
    %191 = vector.extract_strided_slice %179 {offsets = [0, 32], sizes = [2, 32], strides = [1, 1]} : vector<2x96xf32> to vector<2x32xf32>
    %192 = vector.extract_strided_slice %182 {offsets = [0, 32], sizes = [2, 32], strides = [1, 1]} : vector<2x96xf32> to vector<2x32xf32>
    %193 = arith.addf %191, %192 : vector<2x32xf32>
    %194 = arith.negf %193 : vector<2x32xf32>
    %195 = math.exp %194 : vector<2x32xf32>
    %cst_43 = arith.constant 1.000000e+00 : f32
    %196 = vector.broadcast %cst_43 : f32 to vector<2x32xf32>
    %197 = arith.addf %196, %195 : vector<2x32xf32>
    %198 = arith.divf %196, %197 : vector<2x32xf32>
    %199 = vector.extract_strided_slice %179 {offsets = [0, 64], sizes = [2, 32], strides = [1, 1]} : vector<2x96xf32> to vector<2x32xf32>
    %200 = vector.extract_strided_slice %182 {offsets = [0, 64], sizes = [2, 32], strides = [1, 1]} : vector<2x96xf32> to vector<2x32xf32>
    %201 = arith.mulf %190, %200 : vector<2x32xf32>
    %202 = arith.addf %199, %201 : vector<2x32xf32>
    %203 = math.tanh %202 : vector<2x32xf32>
    %cst_44 = arith.constant 1.000000e+00 : f32
    %204 = vector.broadcast %cst_44 : f32 to vector<2x32xf32>
    %205 = arith.subf %204, %198 : vector<2x32xf32>
    %206 = arith.mulf %205, %203 : vector<2x32xf32>
    %207 = arith.mulf %198, %174 : vector<2x32xf32>
    %208 = arith.addf %206, %207 : vector<2x32xf32>
    %c5 = arith.constant 5 : index
    %c0_45 = arith.constant 0 : index
    %c0_46 = arith.constant 0 : index
    %209 = vector.load %arg7[%c5, %c0_45, %c0_46] : memref<8x2x32xf32, #tpu.memory_space<vmem>>, vector<1x2x32xf32>
    %210 = vector.shape_cast %209 : vector<1x2x32xf32> to vector<2x32xf32>
    %211 = vector.shape_cast %208 : vector<2x32xf32> to vector<1x2x32xf32>
    tpu.vector_store %arg7[%c5, %c0_45, %c0_46], %211 {strides = array<i32>} : memref<8x2x32xf32, #tpu.memory_space<vmem>>, vector<1x2x32xf32>,
    %212 = vector.extract_strided_slice %208 {offsets = [1, 0], sizes = [1, 32], strides = [1, 1]} : vector<2x32xf32> to vector<1x32xf32>
    %213 = vector.extract_strided_slice %5 {offsets = [12, 0], sizes = [2, 96], strides = [1, 1]} : vector<16x96xf32> to vector<2x96xf32>
    %cst_47 = arith.constant dense<0.000000e+00> : vector<2x96xf32>
    %214 = tpu.matmul %208, %6, %cst_47 {dimension_numbers = #tpu.dot_dimension_numbers<[1], [0], [0], [1], [0, 0, 1, 1], [], []>} : vector<2x32xf32>, vector<32x96xf32>, vector<2x96xf32> -> vector<2x96xf32>
    %215 = vector.broadcast %7 : vector<1x96xf32> to vector<2x96xf32>
    %216 = arith.addf %214, %215 : vector<2x96xf32>
    %217 = vector.extract_strided_slice %213 {offsets = [0, 0], sizes = [2, 32], strides = [1, 1]} : vector<2x96xf32> to vector<2x32xf32>
    %218 = vector.extract_strided_slice %216 {offsets = [0, 0], sizes = [2, 32], strides = [1, 1]} : vector<2x96xf32> to vector<2x32xf32>
    %219 = arith.addf %217, %218 : vector<2x32xf32>
    %220 = arith.negf %219 : vector<2x32xf32>
    %221 = math.exp %220 : vector<2x32xf32>
    %cst_48 = arith.constant 1.000000e+00 : f32
    %222 = vector.broadcast %cst_48 : f32 to vector<2x32xf32>
    %223 = arith.addf %222, %221 : vector<2x32xf32>
    %224 = arith.divf %222, %223 : vector<2x32xf32>
    %225 = vector.extract_strided_slice %213 {offsets = [0, 32], sizes = [2, 32], strides = [1, 1]} : vector<2x96xf32> to vector<2x32xf32>
    %226 = vector.extract_strided_slice %216 {offsets = [0, 32], sizes = [2, 32], strides = [1, 1]} : vector<2x96xf32> to vector<2x32xf32>
    %227 = arith.addf %225, %226 : vector<2x32xf32>
    %228 = arith.negf %227 : vector<2x32xf32>
    %229 = math.exp %228 : vector<2x32xf32>
    %cst_49 = arith.constant 1.000000e+00 : f32
    %230 = vector.broadcast %cst_49 : f32 to vector<2x32xf32>
    %231 = arith.addf %230, %229 : vector<2x32xf32>
    %232 = arith.divf %230, %231 : vector<2x32xf32>
    %233 = vector.extract_strided_slice %213 {offsets = [0, 64], sizes = [2, 32], strides = [1, 1]} : vector<2x96xf32> to vector<2x32xf32>
    %234 = vector.extract_strided_slice %216 {offsets = [0, 64], sizes = [2, 32], strides = [1, 1]} : vector<2x96xf32> to vector<2x32xf32>
    %235 = arith.mulf %224, %234 : vector<2x32xf32>
    %236 = arith.addf %233, %235 : vector<2x32xf32>
    %237 = math.tanh %236 : vector<2x32xf32>
    %cst_50 = arith.constant 1.000000e+00 : f32
    %238 = vector.broadcast %cst_50 : f32 to vector<2x32xf32>
    %239 = arith.subf %238, %232 : vector<2x32xf32>
    %240 = arith.mulf %239, %237 : vector<2x32xf32>
    %241 = arith.mulf %232, %208 : vector<2x32xf32>
    %242 = arith.addf %240, %241 : vector<2x32xf32>
    %c6 = arith.constant 6 : index
    %c0_51 = arith.constant 0 : index
    %c0_52 = arith.constant 0 : index
    %243 = vector.load %arg7[%c6, %c0_51, %c0_52] : memref<8x2x32xf32, #tpu.memory_space<vmem>>, vector<1x2x32xf32>
    %244 = vector.shape_cast %243 : vector<1x2x32xf32> to vector<2x32xf32>
    %245 = vector.shape_cast %242 : vector<2x32xf32> to vector<1x2x32xf32>
    tpu.vector_store %arg7[%c6, %c0_51, %c0_52], %245 {strides = array<i32>} : memref<8x2x32xf32, #tpu.memory_space<vmem>>, vector<1x2x32xf32>,
    %246 = vector.extract_strided_slice %242 {offsets = [1, 0], sizes = [1, 32], strides = [1, 1]} : vector<2x32xf32> to vector<1x32xf32>
    %247 = vector.extract_strided_slice %5 {offsets = [14, 0], sizes = [2, 96], strides = [1, 1]} : vector<16x96xf32> to vector<2x96xf32>
    %cst_53 = arith.constant dense<0.000000e+00> : vector<2x96xf32>
    %248 = tpu.matmul %242, %6, %cst_53 {dimension_numbers = #tpu.dot_dimension_numbers<[1], [0], [0], [1], [0, 0, 1, 1], [], []>} : vector<2x32xf32>, vector<32x96xf32>, vector<2x96xf32> -> vector<2x96xf32>
    %249 = vector.broadcast %7 : vector<1x96xf32> to vector<2x96xf32>
    %250 = arith.addf %248, %249 : vector<2x96xf32>
    %251 = vector.extract_strided_slice %247 {offsets = [0, 0], sizes = [2, 32], strides = [1, 1]} : vector<2x96xf32> to vector<2x32xf32>
    %252 = vector.extract_strided_slice %250 {offsets = [0, 0], sizes = [2, 32], strides = [1, 1]} : vector<2x96xf32> to vector<2x32xf32>
    %253 = arith.addf %251, %252 : vector<2x32xf32>
    %254 = arith.negf %253 : vector<2x32xf32>
    %255 = math.exp %254 : vector<2x32xf32>
    %cst_54 = arith.constant 1.000000e+00 : f32
    %256 = vector.broadcast %cst_54 : f32 to vector<2x32xf32>
    %257 = arith.addf %256, %255 : vector<2x32xf32>
    %258 = arith.divf %256, %257 : vector<2x32xf32>
    %259 = vector.extract_strided_slice %247 {offsets = [0, 32], sizes = [2, 32], strides = [1, 1]} : vector<2x96xf32> to vector<2x32xf32>
    %260 = vector.extract_strided_slice %250 {offsets = [0, 32], sizes = [2, 32], strides = [1, 1]} : vector<2x96xf32> to vector<2x32xf32>
    %261 = arith.addf %259, %260 : vector<2x32xf32>
    %262 = arith.negf %261 : vector<2x32xf32>
    %263 = math.exp %262 : vector<2x32xf32>
    %cst_55 = arith.constant 1.000000e+00 : f32
    %264 = vector.broadcast %cst_55 : f32 to vector<2x32xf32>
    %265 = arith.addf %264, %263 : vector<2x32xf32>
    %266 = arith.divf %264, %265 : vector<2x32xf32>
    %267 = vector.extract_strided_slice %247 {offsets = [0, 64], sizes = [2, 32], strides = [1, 1]} : vector<2x96xf32> to vector<2x32xf32>
    %268 = vector.extract_strided_slice %250 {offsets = [0, 64], sizes = [2, 32], strides = [1, 1]} : vector<2x96xf32> to vector<2x32xf32>
    %269 = arith.mulf %258, %268 : vector<2x32xf32>
    %270 = arith.addf %267, %269 : vector<2x32xf32>
    %271 = math.tanh %270 : vector<2x32xf32>
    %cst_56 = arith.constant 1.000000e+00 : f32
    %272 = vector.broadcast %cst_56 : f32 to vector<2x32xf32>
    %273 = arith.subf %272, %266 : vector<2x32xf32>
    %274 = arith.mulf %273, %271 : vector<2x32xf32>
    %275 = arith.mulf %266, %242 : vector<2x32xf32>
    %276 = arith.addf %274, %275 : vector<2x32xf32>
    %c7 = arith.constant 7 : index
    %c0_57 = arith.constant 0 : index
    %c0_58 = arith.constant 0 : index
    %277 = vector.load %arg7[%c7, %c0_57, %c0_58] : memref<8x2x32xf32, #tpu.memory_space<vmem>>, vector<1x2x32xf32>
    %278 = vector.shape_cast %277 : vector<1x2x32xf32> to vector<2x32xf32>
    %279 = vector.shape_cast %276 : vector<2x32xf32> to vector<1x2x32xf32>
    tpu.vector_store %arg7[%c7, %c0_57, %c0_58], %279 {strides = array<i32>} : memref<8x2x32xf32, #tpu.memory_space<vmem>>, vector<1x2x32xf32>,
    %280 = vector.extract_strided_slice %276 {offsets = [1, 0], sizes = [1, 32], strides = [1, 1]} : vector<2x32xf32> to vector<1x32xf32>
    %281 = tpu.concatenate %42, %76, %110, %144, %178, %212, %246, %280 in 0 : vector<1x32xf32>, vector<1x32xf32>, vector<1x32xf32>, vector<1x32xf32>, vector<1x32xf32>, vector<1x32xf32>, vector<1x32xf32>, vector<1x32xf32> -> vector<8x32xf32>
    %c0_59 = arith.constant 0 : index
    %c0_60 = arith.constant 0 : index
    %282 = vector.load %arg5[%c0_59, %c0_60] : memref<1x32xf32, #tpu.memory_space<vmem>>, vector<1x32xf32>
    %283 = vector.broadcast %282 : vector<1x32xf32> to vector<8x32xf32>
    %284 = arith.mulf %281, %283 : vector<8x32xf32>
    %cst_61 = arith.constant dense<0.000000e+00> : vector<8xf32>
    %285 = vector.multi_reduction <add>, %284, %cst_61 [1] : vector<8x32xf32> to vector<8xf32>
    %286 = vector.shape_cast %285 : vector<8xf32> to vector<8x1xf32>
    %c0_62 = arith.constant 0 : index
    %c0_63 = arith.constant 0 : index
    %287 = vector.load %arg6[%c0_62, %c0_63] : memref<1x1xf32, #tpu.memory_space<vmem>>, vector<1x1xf32>
    %288 = vector.broadcast %287 : vector<1x1xf32> to vector<8x1xf32>
    %289 = arith.addf %286, %288 : vector<8x1xf32>
    %290 = arith.negf %289 : vector<8x1xf32>
    %291 = math.exp %290 : vector<8x1xf32>
    %cst_64 = arith.constant 1.000000e+00 : f32
    %292 = vector.broadcast %cst_64 : f32 to vector<8x1xf32>
    %293 = arith.addf %292, %291 : vector<8x1xf32>
    %294 = arith.divf %292, %293 : vector<8x1xf32>
    %c0_65 = arith.constant 0 : index
    %c0_66 = arith.constant 0 : index
    %295 = vector.load %arg8[%c0_65, %c0_66] : memref<8x1xf32, #tpu.memory_space<vmem>>, vector<8x1xf32>
    tpu.vector_store %arg8[%c0_65, %c0_66], %294 {strides = array<i32>} : memref<8x1xf32, #tpu.memory_space<vmem>>, vector<8x1xf32>,
    return
  }
}

</mosaic_0001>

<bundles_post_ra>
// kernel: tpu_custom_call.1
= control target key start
LH: loop header
LB: loop body
LE: loop exit
PB: predicated region body
PF: predicated region fallthrough
CT: control target
= control target key end

     0   :  { %s1693_s0 = inlined_call_operand.vmem [shape: f32[16,4], index: 0, kind: input, shape index: {}]   ;;  %s1694_s1 = inlined_call_operand.vmem [shape: f32[4,96], index: 1, kind: input, shape index: {}]   ;;  %s1695_s2 = inlined_call_operand.hbm [shape: f32[32,96], index: 2, kind: input, shape index: {}]   ;;  %s1696_s3 = inlined_call_operand.vmem [shape: f32[1,96], index: 3, kind: input, shape index: {}]   ;;  %s1697_s4 = inlined_call_operand.vmem [shape: f32[1,96], index: 4, kind: input, shape index: {}]   ;;  %s1698_s5 = inlined_call_operand.vmem [shape: f32[1,32], index: 5, kind: input, shape index: {}]   ;;  %s1699_s6 = inlined_call_operand.<no memory space> [shape: f32[1,1], index: 6, kind: input, shape index: {}]   ;;  %s1700_s7 = inlined_call_operand.hbm [shape: f32[8,2,32], index: 7, kind: output, shape index: {0}]   ;;  %s1701_s8 = inlined_call_operand.vmem [shape: f32[8,1], index: 8, kind: output, shape index: {1}]  }
   0x1   :  { %v14_v0 = vstv %s1699_s6 }
   0x2   :  { %15 = vst [vmem:[#allocation2] sm:$0x1] %v14_v0 }
   0x3   :  { %16 = vsyncpa [#allocation4], 0 }
   0x4   :  { %17 = vsyncpa [#allocation5], 0  ;;  %s1425_s29 = smov [#allocation3]   ;;  %s1377_s11 = scalar_lea.hbm %s1695_s2, 512 }
   0x5   :  { %s27_s30 = sshll.u32 %s1425_s29, 4  ;;  %p1378_p0 = scmp.ne.s32.totalorder %s1695_s2, %s1377_s11  ;;  %s28_s30 = int_to_ptr.vmem [resolvable:$true] %s27_s30 }
   0x6   :  { %p1381_p1 = scmp.lt.u32.totalorder %s1377_s11, %s1695_s2 }
   0x8   :  { %p1383_p2 = pnand %p1381_p1, %p1378_p0 }
   0xa   :  { %1386 = shalt.err (!%p1383_p2)
}
   0xb   :  { %s1387_s6 = scalar_lea.vmem %s28_s30, 512  ;;  %p1392_p4 = scmp.lt.s32.totalorder %s28_s30, %s28_s30 }
   0xc   :  { %p1388_p3 = scmp.ne.s32.totalorder %s28_s30, %s1387_s6  ;;  %p1393_p5 = scmp.lt.s32.totalorder %s1387_s6, %s1387_s6 }
   0xe   :  { %p1394_p6 = por %p1393_p5, %p1392_p4 }
  0x10   :  { %p1395_p7 = pnand %p1394_p6, %p1388_p3 }
  0x12   :  { %1398 = shalt.err (!%p1395_p7)
}
  0x13   :  { %s1426_s16 = smov 128   ;;  %s1427_s17 = smov 8  }
  0x14   :  { %33 = dma.hbm_to_vmem [thread:$0]  %s1695_s2, 512, %s28_s30, [#allocation4], %s1426_s16, %s1426_s16, %s1427_s17  }
  0x15   :  { %1421 = dma.done.wait [#allocation4], 512  }
  0x16   :  { %1422 = vsyncadd [#allocation4], 4294966784  ;;  %v1428_v1 = vmov 0.0|0.0   ;;  %vm1429_vm0 = vmmov 0   ;;  %v1430_v2 = vmov 0.0   ;;  %vm62_vm1 = vcmask 1043456  }
  0x17   :  { %1266 = vmatprep.subr.bf16.mxu1 %v1428_v1  ;;  %1186 = vmatprep.mubr.msk.f32.mxu1 %vm1429_vm0, %v1430_v2  ;;  %vm55_vm2 = vcmask 31744   ;;  %v141_v3 = vld [vmem:[#allocation3] sm:$0xff]  ;;  %v142_v4 = vld [vmem:[#allocation3 + $0x8] sm:$0xff]  ;;  %v143_v7 = vld [vmem:[#allocation3 + $0x10] sm:$0xff]  ;;  %s1431_s27 = smov 64   ;;  %vm256_vm3 = vcmask 254976  }
  0x18   :  { %v47_v5 = vld [vmem:[%s1694_s1] sm:$0xf]  ;;  %v1502_v6 = vpack.c.bf16 %v142_v4, %v141_v3  ;;  %v46_v10 = vld [vmem:[%s1693_s0 + $0x8] sm:$0xff]  ;;  %vm152_vm4 = vcmask 261120   ;;  %vm1040_vm5 = vcmask 1040384   ;;  %vm1042_vm6 = vcmask 1041408  }
  0x19   :  { %1173 = vmatprep.subr.msk.mxu0 %vm62_vm1, %v47_v5  ;;  %v144_v8 = vld [vmem:[#allocation3 + $0x18] sm:$0xff]  ;;  %vm1044_vm7 = vcmask 1042432   ;;  %s1433_s29 = smov 32   ;;  %vm1047_vm8 = vcmask 1044480   ;;  %vm1049_vm9 = vcmask 1045504   ;;  %vm1051_vm10 = vcmask 1046528  }
  0x1a   :  { %v45_v9 = vld [vmem:[%s1693_s0] sm:$0xff]  ;;  %1174 = vmatpush3.msk.msra.mxu0 %vm62_vm1, %v47_v5  ;;  %1268 = vmatpush3.bf16.msra.mxu1 %v1502_v6  ;;  %v1513_v11 = vpack.c.bf16 %v144_v8, %v143_v7  ;;  %vm365_vm11 = vcmask 257026   ;;  %vm477_vm12 = vcmask 259076   ;;  %vm589_vm13 = vcmask 261126  }
  0x1b   :  { %1175 = vmatprep.mubr.msk.f32.mxu0 %vm55_vm2, %v45_v9  ;;  %1269 = vmatprep.subr.bf16.mxu1 %v1428_v1  ;;  %v1107_v13 = vld [vmem:[%s1696_s3] ss:$0 sm:$0xff]  ;;  %s1432_s3 = smov 96  }
  0x1c   :  { %1176 = vmatmul.mubr.msk.f32.vlgmr.msra.gmra.mrb[0].mxu0 %vm55_vm2, %v46_v10  ;;  %1272 = vmatprep.subr.bf16.mxu0 %v1428_v1  ;;  %v1540_v16 = vld [vmem:[%s1697_s4] ss:$0 sm:$0xff] }
  0x1d   :  { %1274 = vmatpush3.bf16.msra.mxu0 %v1502_v6  ;;  %1197 = vmatprep.mubr.msk.f32.mxu0 %vm1429_vm0, %v1430_v2 }
  0x1e   :  { %1275 = vmatprep.subr.bf16.mxu0 %v1428_v1  ;;  %1271 = vmatpush3.bf16.msra.mxu1 %v1513_v11 }
  0x1f   :  { %1278 = vmatprep.subr.bf16.mxu1 %v1428_v1 }
  0x21   :  { %1277 = vmatpush3.bf16.msra.mxu0 %v1513_v11  ;;  %1187 = vmatmul.mubr.f32.vlgmr.msra.gmra.mrb[0].mxu1 %v1430_v2 }
  0x22   :  { %1284 = vmatprep.subr.bf16.mxu0 %v1428_v1  ;;  %1280 = vmatpush3.bf16.msra.mxu1 %v1502_v6 }
  0x23   :  { %1208 = vmatprep.mubr.msk.f32.mxu1 %vm1429_vm0, %v1430_v2  ;;  %1281 = vmatprep.subr.bf16.mxu1 %v1428_v1 }
  0x26   :  { %1283 = vmatpush3.bf16.msra.mxu1 %v1513_v11 }
  0x27   :  { %1290 = vmatprep.subr.bf16.mxu1 %v1428_v1 }
  0xef   :  { %v1177_v12 = vpop.f32.mrb[0].mxu0 }
  0xf0   :  { %v1535_v14 = vadd.f32 %v1177_v12, %v1107_v13  ;;  %v132_v15 = vpop.f32.mrb[1].mxu0 }
  0xf1   :  { %v1544_v20 = vadd.f32 %v1107_v13, %v132_v15 }
  0xf4   :  { %v222_v17 = vpop.f32.mrb[0].mxu1 }
  0xf5   :  { %v223_v18 = vadd.f32 %v1540_v16, %v222_v17  ;;  %v1188_v19 = vpop.f32.mrb[1].mxu1 }
  0xf7   :  { %234 = vrot.lane.b32.xlu0 %v223_v18, %s1431_s27  ;;  %v226_v21 = vadd.f32 %v223_v18, %v1544_v20 }
  0xf9   :  { %v1112_v22 = vmul.f32 -1.442695, %v226_v21 }
  0xfb   :  { %1325 = vpow2.f32 %v1112_v22 }
 0x105   :  { %v1326_v23 = vpop.eup %1325 }
 0x106   :  { %v230_v24 = vadd.f32 1.0, %v1326_v23 }
 0x108   :  { %1327 = vrcp.f32 %v230_v24 }
 0x112   :  { %v1328_v25 = vpop.eup %1327 }
 0x113   :  { %v244_v31 = vsub.f32 1.0, %v1328_v25  ;;  %v250_v33 = vmul.f32 0.0, %v1328_v25 }
 0x169   :  { %v235_v26 = vpop.permute.xlu0 %234 }
 0x16a   :  { %v237_v27 = vmul.f32 %v1328_v25, %v235_v26 }
 0x16c   :  { %239 = vrot.lane.b32.xlu0 %v237_v27, %s1431_s27 }
 0x1de   :  { %v240_v28 = vpop.permute.xlu0 %239 }
 0x1df   :  { %v242_v29 = vadd.f32 %v240_v28, %v1544_v20 }
 0x1e1   :  { %1329 = vtanh.f32 %v242_v29 }
 0x1eb   :  { %v1330_v30 = vpop.eup %1329 }
 0x1ec   :  { %246 = vrot.lane.b32.xlu1 %v1330_v30, %s1432_s3 }
 0x25e   :  { %v247_v32 = vpop.permute.xlu1 %246 }
 0x25f   :  { %v249_v34 = vmul.f32 %v247_v32, %v244_v31 }
 0x261   :  { %v251_v35 = vadd.f32 %v250_v33, %v249_v34 }
 0x263   :  { %253 = vrot.lane.b32.xlu1 %v251_v35, %s1432_s3  ;;  %v356_v52 = vrot.slane %v251_v35, 6  ;;  %v1029_v57 = vrot.slane %v251_v35, 1 }
 0x2d5   :  { %v254_v36 = vpop.permute.xlu1 %253 }
 0x2d6   :  { %257 = vst.msk [vmem:[#allocation6] sm:$0x3] %vm256_vm3, %v254_v36  ;;  %1198 = vmatmul.mubr.msk.f32.vlgmr.msra.gmra.mrb[2].mxu0 %vm152_vm4, %v254_v36 }
 0x2d7   :  { %1286 = vmatpush3.bf16.msra.mxu0 %v1502_v6  ;;  %1219 = vmatprep.mubr.msk.f32.mxu0 %vm1429_vm0, %v1430_v2 }
 0x2d8   :  { %1287 = vmatprep.subr.bf16.mxu0 %v1428_v1 }
 0x2db   :  { %1289 = vmatpush3.bf16.msra.mxu0 %v1513_v11 }
 0x2dc   :  { %1296 = vmatprep.subr.bf16.mxu0 %v1428_v1 }
 0x3a9   :  { %v326_v37 = vpop.f32.mrb[2].mxu0 }
 0x3aa   :  { %v327_v38 = vadd.f32 %v1540_v16, %v326_v37  ;;  %v1199_v39 = vpop.f32.mrb[3].mxu0 }
 0x3ac   :  { %v331_v40 = vrot.slane %v327_v38, 6 }
 0x3ae   :  { %340 = vrot.lane.b32.xlu0 %v331_v40, %s1431_s27  ;;  %v333_v41 = vadd.f32 %v331_v40, %v1544_v20 }
 0x3b0   :  { %v1114_v42 = vmul.f32 -1.442695, %v333_v41 }
 0x3b2   :  { %1331 = vpow2.f32 %v1114_v42 }
 0x3bc   :  { %v1332_v43 = vpop.eup %1331 }
 0x3bd   :  { %v337_v44 = vadd.f32 1.0, %v1332_v43 }
 0x3bf   :  { %1333 = vrcp.f32 %v337_v44 }
 0x3c9   :  { %v1334_v45 = vpop.eup %1333 }
 0x3ca   :  { %v350_v51 = vsub.f32 1.0, %v1334_v45  ;;  %v358_v55 = vmul.f32 %v1334_v45, %v356_v52 }
 0x420   :  { %v341_v46 = vpop.permute.xlu0 %340 }
 0x421   :  { %v343_v47 = vmul.f32 %v1334_v45, %v341_v46 }
 0x423   :  { %345 = vrot.lane.b32.xlu1 %v343_v47, %s1431_s27 }
 0x495   :  { %v346_v48 = vpop.permute.xlu1 %345 }
 0x496   :  { %v348_v49 = vadd.f32 %v346_v48, %v1544_v20 }
 0x498   :  { %1335 = vtanh.f32 %v348_v49 }
 0x4a2   :  { %v1336_v50 = vpop.eup %1335 }
 0x4a3   :  { %352 = vrot.lane.b32.xlu0 %v1336_v50, %s1432_s3 }
 0x515   :  { %v353_v53 = vpop.permute.xlu0 %352 }
 0x516   :  { %v355_v54 = vmul.f32 %v353_v53, %v350_v51 }
 0x518   :  { %v1565_v56 = vadd.f32 %v358_v55, %v355_v54 }
 0x51a   :  { %v367_v58 = vrot.slane %v1565_v56, 2  ;;  %v468_v18 = vrot.slane %v1565_v56, 6 }
 0x51c   :  { %368 = vrot.lane.b32.xlu1 %v367_v58, %s1432_s3  ;;  %v1569_v59 = vsel %vm1040_vm5, %v1029_v57, %v367_v58 }
 0x58e   :  { %v369_v60 = vpop.permute.xlu1 %368 }
 0x58f   :  { %1209 = vmatmul.mubr.msk.f32.vlgmr.msra.gmra.mrb[2].mxu1 %vm152_vm4, %v369_v60 }
 0x590   :  { %1292 = vmatpush3.bf16.msra.mxu1 %v1502_v6  ;;  %1230 = vmatprep.mubr.msk.f32.mxu1 %vm1429_vm0, %v1430_v2 }
 0x591   :  { %1293 = vmatprep.subr.bf16.mxu1 %v1428_v1 }
 0x594   :  { %1295 = vmatpush3.bf16.msra.mxu1 %v1513_v11 }
 0x595   :  { %1302 = vmatprep.subr.bf16.mxu1 %v1428_v1 }
 0x662   :  { %v438_v61 = vpop.f32.mrb[2].mxu1 }
 0x663   :  { %v439_v62 = vadd.f32 %v1540_v16, %v438_v61  ;;  %v1210_v63 = vpop.f32.mrb[3].mxu1 }
 0x665   :  { %v443_v0 = vrot.slane %v439_v62, 4 }
 0x667   :  { %452 = vrot.lane.b32.xlu0 %v443_v0, %s1431_s27  ;;  %v445_v3 = vadd.f32 %v443_v0, %v1544_v20 }
 0x669   :  { %v1116_v4 = vmul.f32 -1.442695, %v445_v3 }
 0x66b   :  { %1337 = vpow2.f32 %v1116_v4 }
 0x675   :  { %v1338_v5 = vpop.eup %1337 }
 0x676   :  { %v449_v7 = vadd.f32 1.0, %v1338_v5 }
 0x678   :  { %1339 = vrcp.f32 %v449_v7 }
 0x682   :  { %v1340_v8 = vpop.eup %1339 }
 0x683   :  { %v462_v17 = vsub.f32 1.0, %v1340_v8  ;;  %v470_v21 = vmul.f32 %v1340_v8, %v468_v18 }
 0x6d9   :  { %v453_v9 = vpop.permute.xlu0 %452 }
 0x6da   :  { %v455_v10 = vmul.f32 %v1340_v8, %v453_v9 }
 0x6dc   :  { %457 = vrot.lane.b32.xlu1 %v455_v10, %s1431_s27 }
 0x74e   :  { %v458_v12 = vpop.permute.xlu1 %457 }
 0x74f   :  { %v460_v13 = vadd.f32 %v458_v12, %v1544_v20 }
 0x751   :  { %1341 = vtanh.f32 %v460_v13 }
 0x75b   :  { %v1342_v15 = vpop.eup %1341 }
 0x75c   :  { %464 = vrot.lane.b32.xlu0 %v1342_v15, %s1432_s3 }
 0x7ce   :  { %v465_v19 = vpop.permute.xlu0 %464 }
 0x7cf   :  { %v467_v22 = vmul.f32 %v465_v19, %v462_v17 }
 0x7d1   :  { %v1585_v23 = vadd.f32 %v470_v21, %v467_v22 }
 0x7d3   :  { %v479_v24 = vrot.slane %v1585_v23, 4  ;;  %v580_v41 = vrot.slane %v1585_v23, 6  ;;  %v1032_v0 = vrot.slane %v1585_v23, 3 }
 0x7d5   :  { %480 = vrot.lane.b32.xlu1 %v479_v24, %s1432_s3  ;;  %v1043_v9 = vsel %vm1042_vm6, %v1569_v59, %v1032_v0 }
 0x847   :  { %v481_v25 = vpop.permute.xlu1 %480 }
 0x848   :  { %1220 = vmatmul.mubr.msk.f32.vlgmr.msra.gmra.mrb[4].mxu0 %vm152_vm4, %v481_v25 }
 0x849   :  { %1298 = vmatpush3.bf16.msra.mxu0 %v1502_v6  ;;  %1241 = vmatprep.mubr.msk.f32.mxu0 %vm1429_vm0, %v1430_v2 }
 0x84a   :  { %1299 = vmatprep.subr.bf16.mxu0 %v1428_v1 }
 0x84d   :  { %1301 = vmatpush3.bf16.msra.mxu0 %v1513_v11 }
 0x84e   :  { %1308 = vmatprep.subr.bf16.mxu0 %v1428_v1 }
 0x91b   :  { %v550_v26 = vpop.f32.mrb[4].mxu0 }
 0x91c   :  { %v551_v27 = vadd.f32 %v1540_v16, %v550_v26  ;;  %v1221_v28 = vpop.f32.mrb[5].mxu0 }
 0x91e   :  { %v555_v29 = vrot.slane %v551_v27, 2 }
 0x920   :  { %564 = vrot.lane.b32.xlu0 %v555_v29, %s1431_s27  ;;  %v557_v30 = vadd.f32 %v555_v29, %v1544_v20 }
 0x922   :  { %v1118_v31 = vmul.f32 -1.442695, %v557_v30 }
 0x924   :  { %1343 = vpow2.f32 %v1118_v31 }
 0x92e   :  { %v1344_v32 = vpop.eup %1343 }
 0x92f   :  { %v561_v33 = vadd.f32 1.0, %v1344_v32 }
 0x931   :  { %1345 = vrcp.f32 %v561_v33 }
 0x93b   :  { %v1346_v34 = vpop.eup %1345 }
 0x93c   :  { %v574_v40 = vsub.f32 1.0, %v1346_v34  ;;  %v582_v43 = vmul.f32 %v1346_v34, %v580_v41 }
 0x992   :  { %v565_v35 = vpop.permute.xlu0 %564 }
 0x993   :  { %v567_v36 = vmul.f32 %v1346_v34, %v565_v35 }
 0x995   :  { %569 = vrot.lane.b32.xlu1 %v567_v36, %s1431_s27 }
 0xa07   :  { %v570_v37 = vpop.permute.xlu1 %569 }
 0xa08   :  { %v572_v38 = vadd.f32 %v570_v37, %v1544_v20 }
 0xa0a   :  { %1347 = vtanh.f32 %v572_v38 }
 0xa14   :  { %v1348_v39 = vpop.eup %1347 }
 0xa15   :  { %576 = vrot.lane.b32.xlu0 %v1348_v39, %s1432_s3 }
 0xa87   :  { %v577_v42 = vpop.permute.xlu0 %576 }
 0xa88   :  { %v579_v44 = vmul.f32 %v577_v42, %v574_v40 }
 0xa8a   :  { %v1603_v45 = vadd.f32 %v582_v43, %v579_v44 }
 0xa8c   :  { %v591_v46 = vrot.slane %v1603_v45, 6  ;;  %v1034_v5 = vrot.slane %v1603_v45, 4 }
 0xa8e   :  { %592 = vrot.lane.b32.xlu1 %v591_v46, %s1432_s3  ;;  %v1045_v10 = vsel %vm1044_vm7, %v1043_v9, %v1034_v5 }
 0xb00   :  { %v593_v47 = vpop.permute.xlu1 %592 }
 0xb01   :  { %1231 = vmatmul.mubr.msk.f32.vlgmr.msra.gmra.mrb[4].mxu1 %vm152_vm4, %v593_v47 }
 0xb02   :  { %1304 = vmatpush3.bf16.msra.mxu1 %v1502_v6  ;;  %1252 = vmatprep.mubr.msk.f32.mxu1 %vm1429_vm0, %v1430_v2 }
 0xb03   :  { %1305 = vmatprep.subr.bf16.mxu1 %v1428_v1 }
 0xb06   :  { %1307 = vmatpush3.bf16.msra.mxu1 %v1513_v11 }
 0xbd4   :  { %v662_v20 = vpop.f32.mrb[4].mxu1 }
 0xbd5   :  { %v663_v48 = vadd.f32 %v1540_v16, %v662_v20  ;;  %v1232_v49 = vpop.f32.mrb[5].mxu1 }
 0xbd7   :  { %674 = vrot.lane.b32.xlu0 %v663_v48, %s1431_s27  ;;  %v666_v50 = vadd.f32 %v663_v48, %v1535_v14 }
 0xbd9   :  { %v1120_v51 = vmul.f32 -1.442695, %v666_v50 }
 0xbdb   :  { %1349 = vpow2.f32 %v1120_v51 }
 0xbe5   :  { %v1350_v52 = vpop.eup %1349 }
 0xbe6   :  { %v670_v53 = vadd.f32 1.0, %v1350_v52 }
 0xbe8   :  { %1351 = vrcp.f32 %v670_v53 }
 0xbf2   :  { %v1352_v54 = vpop.eup %1351 }
 0xbf3   :  { %v684_v62 = vsub.f32 1.0, %v1352_v54  ;;  %v691_v3 = vmul.f32 %v1352_v54, %v591_v46 }
 0xc49   :  { %v675_v55 = vpop.permute.xlu0 %674 }
 0xc4a   :  { %v677_v57 = vmul.f32 %v1352_v54, %v675_v55 }
 0xc4c   :  { %679 = vrot.lane.b32.xlu1 %v677_v57, %s1431_s27 }
 0xcbe   :  { %v680_v58 = vpop.permute.xlu1 %679 }
 0xcbf   :  { %v682_v60 = vadd.f32 %v680_v58, %v1535_v14 }
 0xcc1   :  { %1353 = vtanh.f32 %v682_v60 }
 0xccb   :  { %v1354_v61 = vpop.eup %1353 }
 0xccc   :  { %686 = vrot.lane.b32.xlu0 %v1354_v61, %s1432_s3 }
 0xd3e   :  { %v687_v63 = vpop.permute.xlu0 %686 }
 0xd3f   :  { %v689_v4 = vmul.f32 %v687_v63, %v684_v62 }
 0xd41   :  { %v692_v7 = vadd.f32 %v691_v3, %v689_v4 }
 0xd43   :  { %v1036_v8 = vrot.slane %v692_v7, 5  ;;  %694 = vrot.lane.b32.xlu1 %v692_v7, %s1432_s3  ;;  %v797_v28 = vrot.slane %v692_v7, 6 }
 0xd45   :  { %v1624_v12 = vsel %vm62_vm1, %v1045_v10, %v1036_v8 }
 0xdb5   :  { %v695_v13 = vpop.permute.xlu1 %694 }
 0xdb6   :  { %698 = vst.msk [vmem:[#allocation6 + $0x8] sm:$0x3] %vm256_vm3, %v695_v13  ;;  %1242 = vmatmul.mubr.msk.f32.vlgmr.msra.gmra.mrb[6].mxu0 %vm152_vm4, %v695_v13 }
 0xdb7   :  { %1310 = vmatpush3.bf16.msra.mxu0 %v1502_v6  ;;  %1263 = vmatprep.mubr.msk.f32.mxu0 %vm1429_vm0, %v1430_v2 }
 0xdb8   :  { %1311 = vmatprep.subr.bf16.mxu0 %v1428_v1 }
 0xdbb   :  { %1313 = vmatpush3.bf16.msra.mxu0 %v1513_v11 }
 0xe89   :  { %v767_v15 = vpop.f32.mrb[6].mxu0 }
 0xe8a   :  { %v768_v59 = vadd.f32 %v1540_v16, %v767_v15  ;;  %v1243_v17 = vpop.f32.mrb[7].mxu0 }
 0xe8c   :  { %v772_v18 = vrot.slane %v768_v59, 6 }
 0xe8e   :  { %781 = vrot.lane.b32.xlu0 %v772_v18, %s1431_s27  ;;  %v774_v19 = vadd.f32 %v772_v18, %v1535_v14 }
 0xe90   :  { %v1122_v21 = vmul.f32 -1.442695, %v774_v19 }
 0xe92   :  { %1355 = vpow2.f32 %v1122_v21 }
 0xe9c   :  { %v1356_v22 = vpop.eup %1355 }
 0xe9d   :  { %v778_v6 = vadd.f32 1.0, %v1356_v22 }
 0xe9f   :  { %1357 = vrcp.f32 %v778_v6 }
 0xea9   :  { %v1358_v24 = vpop.eup %1357 }
 0xeaa   :  { %v791_v27 = vsub.f32 1.0, %v1358_v24  ;;  %v799_v31 = vmul.f32 %v1358_v24, %v797_v28 }
 0xf00   :  { %v782_v2 = vpop.permute.xlu0 %781 }
 0xf01   :  { %v784_v25 = vmul.f32 %v1358_v24, %v782_v2 }
 0xf03   :  { %786 = vrot.lane.b32.xlu1 %v784_v25, %s1431_s27 }
 0xf75   :  { %v787_v1 = vpop.permute.xlu1 %786 }
 0xf76   :  { %v789_v11 = vadd.f32 %v787_v1, %v1535_v14 }
 0xf78   :  { %1359 = vtanh.f32 %v789_v11 }
 0xf82   :  { %v1360_v26 = vpop.eup %1359 }
 0xf83   :  { %793 = vrot.lane.b32.xlu0 %v1360_v26, %s1432_s3 }
 0xff5   :  { %v794_v29 = vpop.permute.xlu0 %793 }
 0xff6   :  { %v796_v30 = vmul.f32 %v794_v29, %v791_v27 }
 0xff8   :  { %v1639_v32 = vadd.f32 %v799_v31, %v796_v30 }
 0xffa   :  { %v807_v33 = vrot.slane %v1639_v32, 2  ;;  %v908_v50 = vrot.slane %v1639_v32, 6 }
 0xffc   :  { %808 = vrot.lane.b32.xlu1 %v807_v33, %s1432_s3  ;;  %v1048_v24 = vsel %vm1047_vm8, %v1624_v12, %v908_v50 }
0x106e   :  { %v809_v34 = vpop.permute.xlu1 %808 }
0x106f   :  { %1253 = vmatmul.mubr.msk.f32.vlgmr.msra.gmra.mrb[6].mxu1 %vm152_vm4, %v809_v34 }
0x1142   :  { %v878_v35 = vpop.f32.mrb[6].mxu1 }
0x1143   :  { %v879_v36 = vadd.f32 %v1540_v16, %v878_v35  ;;  %v1254_v37 = vpop.f32.mrb[7].mxu1 }
0x1145   :  { %v883_v38 = vrot.slane %v879_v36, 4 }
0x1147   :  { %892 = vrot.lane.b32.xlu0 %v883_v38, %s1431_s27  ;;  %v885_v39 = vadd.f32 %v883_v38, %v1535_v14 }
0x1149   :  { %v1124_v40 = vmul.f32 -1.442695, %v885_v39 }
0x114b   :  { %1361 = vpow2.f32 %v1124_v40 }
0x1155   :  { %v1362_v41 = vpop.eup %1361 }
0x1156   :  { %v889_v42 = vadd.f32 1.0, %v1362_v41 }
0x1158   :  { %1363 = vrcp.f32 %v889_v42 }
0x1162   :  { %v1364_v43 = vpop.eup %1363 }
0x1163   :  { %v902_v49 = vsub.f32 1.0, %v1364_v43  ;;  %v910_v52 = vmul.f32 %v1364_v43, %v908_v50 }
0x11b9   :  { %v893_v44 = vpop.permute.xlu0 %892 }
0x11ba   :  { %v895_v46 = vmul.f32 %v1364_v43, %v893_v44 }
0x11bc   :  { %897 = vrot.lane.b32.xlu1 %v895_v46, %s1431_s27 }
0x122e   :  { %v898_v47 = vpop.permute.xlu1 %897 }
0x122f   :  { %v900_v20 = vadd.f32 %v898_v47, %v1535_v14 }
0x1231   :  { %1365 = vtanh.f32 %v900_v20 }
0x123b   :  { %v1366_v48 = vpop.eup %1365 }
0x123c   :  { %904 = vrot.lane.b32.xlu0 %v1366_v48, %s1432_s3 }
0x12ae   :  { %v905_v51 = vpop.permute.xlu0 %904 }
0x12af   :  { %v907_v53 = vmul.f32 %v905_v51, %v902_v49 }
0x12b1   :  { %v911_v54 = vadd.f32 %v910_v52, %v907_v53 }
0x12b3   :  { %v918_v55 = vrot.slane %v911_v54, 4  ;;  %v1019_v59 = vrot.slane %v911_v54, 6  ;;  %v1038_v18 = vrot.slane %v911_v54, 7 }
0x12b5   :  { %919 = vrot.lane.b32.xlu1 %v918_v55, %s1432_s3  ;;  %v1050_v2 = vsel %vm1049_vm9, %v1048_v24, %v1038_v18 }
0x1327   :  { %v920_v57 = vpop.permute.xlu1 %919 }
0x1328   :  { %1264 = vmatmul.mubr.msk.f32.vlgmr.msra.gmra.mrb[8].mxu0 %vm152_vm4, %v920_v57 }
0x13fb   :  { %v989_v58 = vpop.f32.mrb[8].mxu0 }
0x13fc   :  { %v990_v60 = vadd.f32 %v1540_v16, %v989_v58  ;;  %v1265_v61 = vpop.f32.mrb[9].mxu0  ;;  %v1127_v16 = vld [vmem:[%s1698_s5] ss:$0 sm:$0xff]  ;;  %s1434_s5 = smov [#allocation6]  }
0x13fd   :  { %s1091_s30 = sshll.u32 %s1434_s5, 4  ;;  %s1092_s30 = int_to_ptr.vmem [resolvable:$true] %s1091_s30 }
0x13fe   :  { %v994_v62 = vrot.slane %v990_v60, 2  ;;  %s1399_s9 = scalar_lea.vmem %s1092_s30, 256  ;;  %p1404_p9 = scmp.lt.s32.totalorder %s1092_s30, %s1092_s30 }
0x13ff   :  { %p1400_p8 = scmp.ne.s32.totalorder %s1092_s30, %s1399_s9  ;;  %p1405_p10 = scmp.lt.s32.totalorder %s1399_s9, %s1399_s9 }
0x1400   :  { %1003 = vrot.lane.b32.xlu0 %v994_v62, %s1431_s27  ;;  %v996_v63 = vadd.f32 %v994_v62, %v1535_v14 }
0x1401   :  { %p1406_p11 = por %p1405_p10, %p1404_p9 }
0x1402   :  { %v1126_v0 = vmul.f32 -1.442695, %v996_v63 }
0x1403   :  { %p1407_p12 = pnand %p1406_p11, %p1400_p8 }
0x1404   :  { %1367 = vpow2.f32 %v1126_v0 }
0x140e   :  { %v1368_v3 = vpop.eup %1367 }
0x140f   :  { %v1000_v4 = vadd.f32 1.0, %v1368_v3 }
0x1411   :  { %1369 = vrcp.f32 %v1000_v4 }
0x141b   :  { %v1370_v5 = vpop.eup %1369 }
0x141c   :  { %v1013_v15 = vsub.f32 1.0, %v1370_v5  ;;  %v1021_v19 = vmul.f32 %v1370_v5, %v1019_v59 }
0x1472   :  { %v1004_v7 = vpop.permute.xlu0 %1003 }
0x1473   :  { %v1006_v8 = vmul.f32 %v1370_v5, %v1004_v7 }
0x1475   :  { %1008 = vrot.lane.b32.xlu1 %v1006_v8, %s1431_s27 }
0x1479   :  { %1059 = vrot.lane.b32.xlu1 %v1127_v16, %s1433_s29 }
0x14e7   :  { %v1009_v9 = vpop.permute.xlu1 %1008 }
0x14e8   :  { %v1011_v10 = vadd.f32 %v1009_v9, %v1535_v14 }
0x14ea   :  { %1371 = vtanh.f32 %v1011_v10 }
0x14eb   :  { %v1060_v6 = vpop.permute.xlu1 %1059 }
0x14f4   :  { %v1372_v13 = vpop.eup %1371 }
0x14f5   :  { %1015 = vrot.lane.b32.xlu0 %v1372_v13, %s1432_s3 }
0x1567   :  { %v1016_v17 = vpop.permute.xlu0 %1015 }
0x1568   :  { %v1018_v21 = vmul.f32 %v1016_v17, %v1013_v15 }
0x156a   :  { %v1022_v22 = vadd.f32 %v1021_v19, %v1018_v21 }
0x156c   :  { %v1052_v25 = vsel %vm1051_vm10, %v1050_v2, %v1022_v22 }
0x156d   :  { %v1062_v14 = vmul.f32 %v1060_v6, %v1052_v25 }
0x156f   :  { %1064 = vrot.lane.b32.xlu0 %v1062_v14, %s1432_s3 }
0x1573   :  { %361 = vrot.lane.b32.xlu0 %v1565_v56, %s1432_s3 }
0x1577   :  { %473 = vrot.lane.b32.xlu0 %v1585_v23, %s1432_s3 }
0x157b   :  { %585 = vrot.lane.b32.xlu0 %v1603_v45, %s1432_s3 }
0x157f   :  { %802 = vrot.lane.b32.xlu0 %v1639_v32, %s1432_s3 }
0x1583   :  { %913 = vrot.lane.b32.xlu0 %v911_v54, %s1432_s3 }
0x1587   :  { %1024 = vrot.lane.b32.xlu0 %v1022_v22, %s1432_s3 }
0x15e1   :  { %v1065_v12 = vpop.permute.xlu0 %1064 }
0x15e2   :  { %v1067_v1 = vsel %vm152_vm4, %v1065_v12, 0.0 }
0x15e3   :  { %1068 = vadd.xlane.f32.xlu1 %v1067_v1 }
0x15e5   :  { %v362_v11 = vpop.permute.xlu0 %361 }
0x15e6   :  { %366 = vst.msk [vmem:[#allocation6] sm:$0xc] %vm365_vm11, %v362_v11 }
0x15e9   :  { %v474_v56 = vpop.permute.xlu0 %473 }
0x15ea   :  { %478 = vst.msk [vmem:[#allocation6] sm:$0x30] %vm477_vm12, %v474_v56 }
0x15ed   :  { %v586_v23 = vpop.permute.xlu0 %585 }
0x15ee   :  { %590 = vst.msk [vmem:[#allocation6] sm:$0xc0] %vm589_vm13, %v586_v23 }
0x15f1   :  { %v803_v45 = vpop.permute.xlu0 %802 }
0x15f2   :  { %806 = vst.msk [vmem:[#allocation6 + $0x8] sm:$0xc] %vm365_vm11, %v803_v45 }
0x15f5   :  { %v914_v26 = vpop.permute.xlu0 %913 }
0x15f6   :  { %917 = vst.msk [vmem:[#allocation6 + $0x8] sm:$0x30] %vm477_vm12, %v914_v26 }
0x15f9   :  { %v1025_v27 = vpop.permute.xlu0 %1024 }
0x15fa   :  { %1028 = vst.msk [vmem:[#allocation6 + $0x8] sm:$0xc0] %vm589_vm13, %v1025_v27 }
0x15fb   :  { %1410 = shalt.err (!%p1407_p12)
}
0x15fc   :  { %s1411_s12 = scalar_lea.hbm %s1700_s7, 256 }
0x15fd   :  { %p1412_p13 = scmp.ne.s32.totalorder %s1700_s7, %s1411_s12  ;;  %p1415_p0 = scmp.lt.u32.totalorder %s1411_s12, %s1700_s7 }
0x15ff   :  { %p1417_p1 = pnand %p1415_p0, %p1412_p13 }
0x1601   :  { %1420 = shalt.err (!%p1417_p1)
}
0x1602   :  { %s1435_s16 = smov 2   ;;  %v1128_v28 = vld [vmem:[#allocation2] ss:$0 sm:$0xff]  ;;  %vm1084_vm14 = vcmask 7168  }
0x1603   :  { %1097 = dma.vmem_to_hbm [thread:$0]  %s1092_s30, 256, %s1700_s7, [#allocation5], %s1433_s29, %s1433_s29, %s1435_s16  }
0x1670   :  { %v1069_v29 = vpop.xlane.xlu1 %1068 }
0x1671   :  { %v1077_v30 = vadd.f32 %v1128_v28, %v1069_v29 }
0x1673   :  { %v1129_v31 = vmul.f32 -1.442695, %v1077_v30 }
0x1675   :  { %1373 = vpow2.f32 %v1129_v31 }
0x167f   :  { %v1374_v32 = vpop.eup %1373 }
0x1680   :  { %v1081_v33 = vadd.f32 1.0, %v1374_v32 }
0x1682   :  { %1375 = vrcp.f32 %v1081_v33 }
0x168c   :  { %v1376_v34 = vpop.eup %1375 }
0x168d   :  { %1085 = vst.msk [vmem:[%s1701_s8] sm:$0xff] %vm1084_vm14, %v1376_v34 }
0x168e   :  { %1423 = dma.done.wait [#allocation5], 256  }
0x168f   :  { %1424 = vsyncadd [#allocation5], 4294967040 }
0x1690   :  { %1105 = vsyncpa [#allocation4], 1 }
0x1691   :  { %1106 = vsyncpa [#allocation5], 1 }

</bundles_post_ra>
